<compile_context>
chip_gen: v7x
topology: tpu7x:2x2x1
jax: 0.10.0
libtpu: 0.0.40
codegen_flags: <defaults>
</compile_context>

<pallas_src>
import functools

import jax
import jax.numpy as jnp
from jax.experimental import pallas as pl
from jax.experimental.pallas import tpu as pltpu


def _exceptions_mse_kernel(ew_ref, out_ref, tgt_ref,
                           loss_ref, reg_ref, excl_ref,
                           *, tile_n, n_valid, tiles_per_core):
    p = pl.program_id(0)          # core split (size 1 by default)
    t = pl.program_id(1)          # tile index within this split (reduction axis)

    @pl.when(t == 0)
    def _init():
        loss_ref[...] = jnp.zeros_like(loss_ref)
        reg_ref[...] = jnp.zeros_like(reg_ref)
        excl_ref[...] = jnp.zeros_like(excl_ref)

    # Native-dtype block load (bf16 halves HBM traffic); all math in f32.
    x = out_ref[...].astype(jnp.float32)               # (tile_n, D)
    y = tgt_ref[...].astype(jnp.float32)               # (tile_n, D)
    diff = x - y
    # Raw per-row sum of squares; the / D is hoisted to the wrapper.
    ss = jnp.sum(diff * diff, axis=1, keepdims=True)   # (tile_n, 1) f32

    # Ragged tail handled in-kernel: rows of the edge block beyond N contain
    # undefined data, so mask them out (no HBM-side padding of the big inputs).
    row0 = (p * tiles_per_core + t) * tile_n
    rows = jax.lax.broadcasted_iota(jnp.int32, (tile_n, 1), 0) + row0
    ss = jnp.where(rows < n_valid, ss, 0.0)

    # exc/weight columns come from a zero-padded array, so they are valid
    # (zero) on any padded row; together with the masked ss every padded row
    # contributes exactly 0 to all three accumulators.
    ew = ew_ref[...]                                    # (tile_n, 2) f32
    exc = ew[:, 0:1]                                    # 1.0 = exception
    w = ew[:, 1:2]

    total = jnp.sum(ss)
    excl = jnp.sum(ss * exc)
    loss_ref[...] += jnp.sum(ss * w)                    # weighted-loss partial
    excl_ref[...] += excl                               # exception-row partial
    reg_ref[...] += total - excl                        # non-exception partial


def _pick_tile_n(n, d):
    """Rows per streaming block.

    Budgeted against the f32 VMEM footprint of one block (last dim padded to
    128 lanes), with room for: 2 big inputs x 2 pipeline buffers (native
    dtype), in-kernel f32 temporaries, and the lane-padded (tile_n, 2)
    exc/weight block x 2 buffers -- comfortably inside a 48 MiB scoped-VMEM
    limit on v5e / v6e / v7x.
    """
    d_pad = -(-int(d) // 128) * 128          # VMEM lane padding of the last dim
    per_block_f32_budget = 4 * 1024 * 1024   # ~4 MiB: at the HBM-roofline plateau
    rows = per_block_f32_budget // (d_pad * 4)
    rows = max(16, min(4096, (rows // 16) * 16))   # mult of 16 (bf16 sublane pack)
    n_rounded = -(-int(n) // 16) * 16
    return int(max(16, min(rows, n_rounded)))


@functools.partial(jax.jit, static_argnames=("tile_n", "num_splits"))
def _exceptions_mse_pallas(output, target, ew, *, tile_n, num_splits):
    N, D = output.shape
    num_tiles = -(-N // tile_n)
    tiles_per_core = -(-num_tiles // num_splits)
    tiles_total = tiles_per_core * num_splits

    # Only the tiny exc/weight columns are padded so all of their blocks are
    # in bounds; the big (N, D) inputs are streamed unpadded (no extra HBM pass).
    n_cols = tiles_total * tile_n
    if ew.shape[0] != n_cols:
        ew = jnp.pad(ew, ((0, n_cols - ew.shape[0]), (0, 0)))

    kernel = functools.partial(_exceptions_mse_kernel,
                               tile_n=tile_n, n_valid=N,
                               tiles_per_core=tiles_per_core)

    def row_map(p, t):
        return (p * tiles_per_core + t, 0)

    def acc_map(p, t):
        return (p, 0, 0)

    scalar_shape = jax.ShapeDtypeStruct((num_splits, 1, 1), jnp.float32)
    itemsize = jnp.dtype(output.dtype).itemsize
    cost = pl.CostEstimate(
        flops=3 * N * D,
        transcendentals=0,
        bytes_accessed=2 * N * D * itemsize + ew.size * 4 + 3 * num_splits * 4)

    # num_splits == 1: trivial leading axis.  num_splits > 1 (opt-in, e.g. on
    # v7x): CORE_PARALLEL shards the batch across the two TensorCores.
    split_sem = pltpu.CORE_PARALLEL if num_splits > 1 else pltpu.ARBITRARY

    loss_p, reg_p, excl_p = pl.pallas_call(
        kernel,
        out_shape=(scalar_shape, scalar_shape, scalar_shape),
        grid=(num_splits, tiles_per_core),
        in_specs=[
            pl.BlockSpec((tile_n, 2), row_map),   # [is_exception, weight] columns
            pl.BlockSpec((tile_n, D), row_map),   # output (native dtype)
            pl.BlockSpec((tile_n, D), row_map),   # target (native dtype)
        ],
        out_specs=(
            pl.BlockSpec((1, 1, 1), acc_map),     # weighted loss partial
            pl.BlockSpec((1, 1, 1), acc_map),     # non-exception partial
            pl.BlockSpec((1, 1, 1), acc_map),     # exception partial
        ),
        compiler_params=pltpu.CompilerParams(
            dimension_semantics=(split_sem, pltpu.ARBITRARY),
            vmem_limit_bytes=48 * 1024 * 1024,
        ),
        cost_estimate=cost,
    )(ew, output, target)

    # Combine per-split partials and apply the hoisted 1/D once (tiny, plain JAX).
    inv_d = jnp.float32(1.0 / D)
    return (jnp.sum(loss_p) * inv_d,
            jnp.sum(reg_p) * inv_d,
            jnp.sum(excl_p) * inv_d)


def compute_weights(is_exception, exc_scale=2.0):
    """Deterministic stand-in for the `compute_weights_fn` passed to __init__.

    Exceptions get `exc_scale`x weight; normalised by N so the weighted loss is
    a (re-weighted) mean.
    """
    n = is_exception.shape[0]
    w = jnp.where(is_exception, exc_scale, 1.0).astype(jnp.float32)
    return w / jnp.float32(n)


class ExceptionsMSELoss:
    """Forward-only JAX/Pallas port of the PyTorch ExceptionsMSELoss module."""

    def __init__(self, compute_weights_fn, tile_n=None, num_splits=1):
        self.compute_weights = compute_weights_fn
        self.tile_n = tile_n
        self.num_splits = num_splits

    def __call__(self, output, target, is_exception, *args, **kwargs):
        weights = self.compute_weights(*args, **kwargs)      # (N,)
        N, D = output.shape
        exc_f = jnp.asarray(is_exception).astype(jnp.float32)
        w_f = jnp.asarray(weights, jnp.float32)
        ew = jnp.stack([exc_f, w_f], axis=1)                 # (N, 2) f32

        tile_n = self.tile_n or _pick_tile_n(N, D)
        tile_n = -(-int(tile_n) // 16) * 16                  # enforce sublane-safe multiple

        # TODO(synk): for D < 128, fold g = 128 // D logical rows into the lane
        # axis (view (N, D) as (N/g, g*D)) to restore full lane density.
        loss, loss_reg, loss_exc = _exceptions_mse_pallas(
            output, target, ew, tile_n=tile_n, num_splits=self.num_splits)
        # TODO(synk): PyTorch returns loss_reg/loss_exc via .item() (host floats);
        # here they stay as 0-d device scalars — caller can float(...) them.
        return loss, loss_reg, loss_exc, weights


def _reference(output, target, is_exception, weights):
    out_f = output.astype(jnp.float32)
    tgt_f = target.astype(jnp.float32)
    lpi = jnp.mean((out_f - tgt_f) ** 2, axis=1)
    loss = jnp.sum(lpi * weights)
    reg = jnp.sum(jnp.where(is_exception, 0.0, lpi))
    exc = jnp.sum(jnp.where(is_exception, lpi, 0.0))
    return loss, reg, exc


if __name__ == "__main__":
    key = jax.random.PRNGKey(0)
    k1, k2, k3, k4, k5, k6 = jax.random.split(key, 6)

    loss_fn = ExceptionsMSELoss(compute_weights)

    # Case 1: small f32 batch.
    N, D = 8, 32
    output = jax.random.normal(k1, (N, D), dtype=jnp.float32)
    target = jax.random.normal(k2, (N, D), dtype=jnp.float32)
    is_exception = jax.random.bernoulli(k3, p=0.25, shape=(N,))

    loss, loss_reg, loss_exc, weights = loss_fn(output, target, is_exception, is_exception)
    jax.block_until_ready((loss, loss_reg, loss_exc, weights))

    loss_r, reg_r, exc_r = _reference(output, target, is_exception,
                                      compute_weights(is_exception))
    assert jnp.allclose(loss, loss_r, rtol=1e-4, atol=1e-5), (loss, loss_r)
    assert jnp.allclose(loss_reg, reg_r, rtol=1e-4, atol=1e-5), (loss_reg, reg_r)
    assert jnp.allclose(loss_exc, exc_r, rtol=1e-4, atol=1e-5), (loss_exc, exc_r)

    # Case 2: ragged batch (exercises in-kernel tail masking, no HBM padding)
    # with bf16 inputs (exercises native-dtype DMA + in-kernel f32 cast).
    N2, D2 = 23, 48
    output2 = jax.random.normal(k4, (N2, D2), dtype=jnp.bfloat16)
    target2 = jax.random.normal(k5, (N2, D2), dtype=jnp.bfloat16)
    is_exception2 = jax.random.bernoulli(k6, p=0.3, shape=(N2,))

    loss2, reg2, exc2, w2 = loss_fn(output2, target2, is_exception2, is_exception2)
    jax.block_until_ready((loss2, reg2, exc2, w2))

    loss2_r, reg2_r, exc2_r = _reference(output2, target2, is_exception2,
                                         compute_weights(is_exception2))
    assert jnp.allclose(loss2, loss2_r, rtol=1e-4, atol=1e-5), (loss2, loss2_r)
    assert jnp.allclose(reg2, reg2_r, rtol=1e-4, atol=1e-5), (reg2, reg2_r)
    assert jnp.allclose(exc2, exc2_r, rtol=1e-4, atol=1e-5), (exc2, exc2_r)

    print("KERNEL_OK")
</pallas_src>

<mosaic_0001>
module attributes {stable_mosaic.version = 11 : i64} {
  func.func @_exceptions_mse_kernel(%arg0: i32, %arg1: i32, %arg2: memref<16x2xf32, #tpu.memory_space<vmem>>, %arg3: memref<16x32xf32, #tpu.memory_space<vmem>>, %arg4: memref<16x32xf32, #tpu.memory_space<vmem>>, %arg5: memref<1x1x1xf32, #tpu.memory_space<vmem>>, %arg6: memref<1x1x1xf32, #tpu.memory_space<vmem>>, %arg7: memref<1x1x1xf32, #tpu.memory_space<vmem>>) attributes {dimension_semantics = [#tpu.dimension_semantics<arbitrary>, #tpu.dimension_semantics<arbitrary>], iteration_bounds = array<i64: 1, 1>, scalar_prefetch = 0 : i64, scratch_operands = 0 : i64, tpu.core_type = #tpu.core_type<tc>, window_params = [{transform_indices = @transform_0, window_bounds = array<i64: 16, 2>}, {transform_indices = @transform_1, window_bounds = array<i64: 16, 32>}, {transform_indices = @transform_2, window_bounds = array<i64: 16, 32>}, {transform_indices = @transform_3, window_bounds = array<i64: 1, 1, 1>}, {transform_indices = @transform_4, window_bounds = array<i64: 1, 1, 1>}, {transform_indices = @transform_5, window_bounds = array<i64: 1, 1, 1>}]} {
    %c0_i32 = arith.constant 0 : i32
    %0 = arith.cmpi eq, %arg1, %c0_i32 : i32
    %1 = arith.extui %0 : i1 to i32
    %c0_i32_0 = arith.constant 0 : i32
    %2 = arith.cmpi ne, %1, %c0_i32_0 : i32
    scf.if %2 {
      %cst_28 = arith.constant 0.000000e+00 : f32
      %49 = vector.broadcast %cst_28 : f32 to vector<1x1x1xf32>
      %c0_29 = arith.constant 0 : index
      %c0_30 = arith.constant 0 : index
      %c0_31 = arith.constant 0 : index
      %50 = vector.load %arg5[%c0_29, %c0_30, %c0_31] : memref<1x1x1xf32, #tpu.memory_space<vmem>>, vector<1x1x1xf32>
      tpu.vector_store %arg5[%c0_29, %c0_30, %c0_31], %49 {strides = array<i32>} : memref<1x1x1xf32, #tpu.memory_space<vmem>>, vector<1x1x1xf32>,
      %cst_32 = arith.constant 0.000000e+00 : f32
      %51 = vector.broadcast %cst_32 : f32 to vector<1x1x1xf32>
      %c0_33 = arith.constant 0 : index
      %c0_34 = arith.constant 0 : index
      %c0_35 = arith.constant 0 : index
      %52 = vector.load %arg6[%c0_33, %c0_34, %c0_35] : memref<1x1x1xf32, #tpu.memory_space<vmem>>, vector<1x1x1xf32>
      tpu.vector_store %arg6[%c0_33, %c0_34, %c0_35], %51 {strides = array<i32>} : memref<1x1x1xf32, #tpu.memory_space<vmem>>, vector<1x1x1xf32>,
      %cst_36 = arith.constant 0.000000e+00 : f32
      %53 = vector.broadcast %cst_36 : f32 to vector<1x1x1xf32>
      %c0_37 = arith.constant 0 : index
      %c0_38 = arith.constant 0 : index
      %c0_39 = arith.constant 0 : index
      %54 = vector.load %arg7[%c0_37, %c0_38, %c0_39] : memref<1x1x1xf32, #tpu.memory_space<vmem>>, vector<1x1x1xf32>
      tpu.vector_store %arg7[%c0_37, %c0_38, %c0_39], %53 {strides = array<i32>} : memref<1x1x1xf32, #tpu.memory_space<vmem>>, vector<1x1x1xf32>,
    } else {
    }
    %c0 = arith.constant 0 : index
    %c0_1 = arith.constant 0 : index
    %3 = vector.load %arg3[%c0, %c0_1] : memref<16x32xf32, #tpu.memory_space<vmem>>, vector<16x32xf32>
    %c0_2 = arith.constant 0 : index
    %c0_3 = arith.constant 0 : index
    %4 = vector.load %arg4[%c0_2, %c0_3] : memref<16x32xf32, #tpu.memory_space<vmem>>, vector<16x32xf32>
    %5 = arith.subf %3, %4 : vector<16x32xf32>
    %6 = arith.mulf %5, %5 : vector<16x32xf32>
    %cst = arith.constant dense<0.000000e+00> : vector<16xf32>
    %7 = vector.multi_reduction <add>, %6, %cst [1] : vector<16x32xf32> to vector<16xf32>
    %8 = vector.shape_cast %7 : vector<16xf32> to vector<16x1xf32>
    %c1_i32 = arith.constant 1 : i32
    %9 = arith.muli %arg0, %c1_i32 : i32
    %10 = arith.addi %9, %arg1 : i32
    %c16_i32 = arith.constant 16 : i32
    %11 = arith.muli %10, %c16_i32 : i32
    %12 = tpu.iota {dimensions = array<i32: 0>} : vector<16x1xi32>
    %13 = vector.broadcast %11 : i32 to vector<16x1xi32>
    %14 = arith.addi %12, %13 : vector<16x1xi32>
    %c8_i32 = arith.constant 8 : i32
    %15 = vector.broadcast %c8_i32 : i32 to vector<16x1xi32>
    %16 = arith.cmpi slt, %14, %15 : vector<16x1xi32>
    %cst_4 = arith.constant 0.000000e+00 : f32
    %17 = vector.broadcast %cst_4 : f32 to vector<16x1xf32>
    %18 = arith.select %16, %8, %17 : vector<16x1xi1>, vector<16x1xf32>
    %c0_5 = arith.constant 0 : index
    %c0_6 = arith.constant 0 : index
    %19 = vector.load %arg2[%c0_5, %c0_6] : memref<16x2xf32, #tpu.memory_space<vmem>>, vector<16x2xf32>
    %20 = vector.extract_strided_slice %19 {offsets = [0, 0], sizes = [16, 1], strides = [1, 1]} : vector<16x2xf32> to vector<16x1xf32>
    %21 = vector.extract_strided_slice %19 {offsets = [0, 1], sizes = [16, 1], strides = [1, 1]} : vector<16x2xf32> to vector<16x1xf32>
    %22 = vector.shape_cast %18 : vector<16x1xf32> to vector<1x16x1xf32>
    %cst_7 = arith.constant dense<0.000000e+00> : vector<1xf32>
    %23 = vector.multi_reduction <add>, %22, %cst_7 [1, 2] : vector<1x16x1xf32> to vector<1xf32>
    %24 = vector.shape_cast %23 : vector<1xf32> to vector<1x1x1xf32>
    %25 = vector.extract %24[0, 0, 0] : f32 from vector<1x1x1xf32>
    %26 = arith.mulf %18, %20 : vector<16x1xf32>
    %27 = vector.shape_cast %26 : vector<16x1xf32> to vector<1x16x1xf32>
    %cst_8 = arith.constant dense<0.000000e+00> : vector<1xf32>
    %28 = vector.multi_reduction <add>, %27, %cst_8 [1, 2] : vector<1x16x1xf32> to vector<1xf32>
    %29 = vector.shape_cast %28 : vector<1xf32> to vector<1x1x1xf32>
    %30 = vector.extract %29[0, 0, 0] : f32 from vector<1x1x1xf32>
    %c0_9 = arith.constant 0 : index
    %c0_10 = arith.constant 0 : index
    %c0_11 = arith.constant 0 : index
    %31 = vector.load %arg5[%c0_9, %c0_10, %c0_11] : memref<1x1x1xf32, #tpu.memory_space<vmem>>, vector<1x1x1xf32>
    %32 = arith.mulf %18, %21 : vector<16x1xf32>
    %33 = vector.shape_cast %32 : vector<16x1xf32> to vector<1x16x1xf32>
    %cst_12 = arith.constant dense<0.000000e+00> : vector<1xf32>
    %34 = vector.multi_reduction <add>, %33, %cst_12 [1, 2] : vector<1x16x1xf32> to vector<1xf32>
    %35 = vector.shape_cast %34 : vector<1xf32> to vector<1x1x1xf32>
    %36 = vector.extract %35[0, 0, 0] : f32 from vector<1x1x1xf32>
    %37 = vector.broadcast %36 : f32 to vector<1x1x1xf32>
    %38 = arith.addf %31, %37 : vector<1x1x1xf32>
    %c0_13 = arith.constant 0 : index
    %c0_14 = arith.constant 0 : index
    %c0_15 = arith.constant 0 : index
    %39 = vector.load %arg5[%c0_13, %c0_14, %c0_15] : memref<1x1x1xf32, #tpu.memory_space<vmem>>, vector<1x1x1xf32>
    tpu.vector_store %arg5[%c0_13, %c0_14, %c0_15], %38 {strides = array<i32>} : memref<1x1x1xf32, #tpu.memory_space<vmem>>, vector<1x1x1xf32>,
    %c0_16 = arith.constant 0 : index
    %c0_17 = arith.constant 0 : index
    %c0_18 = arith.constant 0 : index
    %40 = vector.load %arg7[%c0_16, %c0_17, %c0_18] : memref<1x1x1xf32, #tpu.memory_space<vmem>>, vector<1x1x1xf32>
    %41 = vector.broadcast %30 : f32 to vector<1x1x1xf32>
    %42 = arith.addf %40, %41 : vector<1x1x1xf32>
    %c0_19 = arith.constant 0 : index
    %c0_20 = arith.constant 0 : index
    %c0_21 = arith.constant 0 : index
    %43 = vector.load %arg7[%c0_19, %c0_20, %c0_21] : memref<1x1x1xf32, #tpu.memory_space<vmem>>, vector<1x1x1xf32>
    tpu.vector_store %arg7[%c0_19, %c0_20, %c0_21], %42 {strides = array<i32>} : memref<1x1x1xf32, #tpu.memory_space<vmem>>, vector<1x1x1xf32>,
    %c0_22 = arith.constant 0 : index
    %c0_23 = arith.constant 0 : index
    %c0_24 = arith.constant 0 : index
    %44 = vector.load %arg6[%c0_22, %c0_23, %c0_24] : memref<1x1x1xf32, #tpu.memory_space<vmem>>, vector<1x1x1xf32>
    %45 = arith.subf %25, %30 : f32
    %46 = vector.broadcast %45 : f32 to vector<1x1x1xf32>
    %47 = arith.addf %44, %46 : vector<1x1x1xf32>
    %c0_25 = arith.constant 0 : index
    %c0_26 = arith.constant 0 : index
    %c0_27 = arith.constant 0 : index
    %48 = vector.load %arg6[%c0_25, %c0_26, %c0_27] : memref<1x1x1xf32, #tpu.memory_space<vmem>>, vector<1x1x1xf32>
    tpu.vector_store %arg6[%c0_25, %c0_26, %c0_27], %47 {strides = array<i32>} : memref<1x1x1xf32, #tpu.memory_space<vmem>>, vector<1x1x1xf32>,
    return
  }
  func.func @transform_0(%arg0: i32, %arg1: i32) -> (i32, i32) {
    %c1_i32 = arith.constant 1 : i32
    %0 = arith.muli %arg0, %c1_i32 : i32
    %1 = arith.addi %0, %arg1 : i32
    %c0_i32 = arith.constant 0 : i32
    %c0_i32_0 = arith.constant 0 : i32
    return %1, %c0_i32 : i32, i32
  }
  func.func @transform_1(%arg0: i32, %arg1: i32) -> (i32, i32) {
    %c1_i32 = arith.constant 1 : i32
    %0 = arith.muli %arg0, %c1_i32 : i32
    %1 = arith.addi %0, %arg1 : i32
    %c0_i32 = arith.constant 0 : i32
    %c0_i32_0 = arith.constant 0 : i32
    return %1, %c0_i32 : i32, i32
  }
  func.func @transform_2(%arg0: i32, %arg1: i32) -> (i32, i32) {
    %c1_i32 = arith.constant 1 : i32
    %0 = arith.muli %arg0, %c1_i32 : i32
    %1 = arith.addi %0, %arg1 : i32
    %c0_i32 = arith.constant 0 : i32
    %c0_i32_0 = arith.constant 0 : i32
    return %1, %c0_i32 : i32, i32
  }
  func.func @transform_3(%arg0: i32, %arg1: i32) -> (i32, i32, i32) {
    %c0_i32 = arith.constant 0 : i32
    %c0_i32_0 = arith.constant 0 : i32
    %c0_i32_1 = arith.constant 0 : i32
    return %arg0, %c0_i32, %c0_i32_0 : i32, i32, i32
  }
  func.func @transform_4(%arg0: i32, %arg1: i32) -> (i32, i32, i32) {
    %c0_i32 = arith.constant 0 : i32
    %c0_i32_0 = arith.constant 0 : i32
    %c0_i32_1 = arith.constant 0 : i32
    return %arg0, %c0_i32, %c0_i32_0 : i32, i32, i32
  }
  func.func @transform_5(%arg0: i32, %arg1: i32) -> (i32, i32, i32) {
    %c0_i32 = arith.constant 0 : i32
    %c0_i32_0 = arith.constant 0 : i32
    %c0_i32_1 = arith.constant 0 : i32
    return %arg0, %c0_i32, %c0_i32_0 : i32, i32, i32
  }
}

</mosaic_0001>

<bundles_post_ra>
// kernel: _exceptions_mse_pallas.1
= control target key start
LH: loop header
LB: loop body
LE: loop exit
PB: predicated region body
PF: predicated region fallthrough
CT: control target
= control target key end

     0   :  { %11 = vsyncpa [#allocation3], 0  ;;  %s445_s0 = inlined_call_operand.vmem [shape: f32[16,2], index: 0, kind: input, shape index: {}]   ;;  %s446_s1 = inlined_call_operand.vmem [shape: f32[8,32], index: 1, kind: input, shape index: {}]   ;;  %s447_s2 = inlined_call_operand.vmem [shape: f32[8,32], index: 2, kind: input, shape index: {}]   ;;  %s448_s3 = inlined_call_operand.hbm [shape: f32[1,1,1], index: 3, kind: output, shape index: {0}]   ;;  %s449_s4 = inlined_call_operand.hbm [shape: f32[1,1,1], index: 4, kind: output, shape index: {1}]   ;;  %s450_s5 = inlined_call_operand.hbm [shape: f32[1,1,1], index: 5, kind: output, shape index: {2}]  }
   0x1   :  { %v113_v0 = vld [vmem:[%s446_s1] sm:$0xff]  ;;  %v141_v2 = vld [vmem:[%s445_s0 + $0x8] sm:$0xff] }
   0x2   :  { %v115_v1 = vld [vmem:[%s447_s2] sm:$0xff]  ;;  %v156_v4 = vmul.f32 0.0, %v141_v2 }
   0x3   :  { %v117_v3 = vsub.f32 %v113_v0, %v115_v1 }
   0x4   :  { %12 = vsyncpa [#allocation5], 0  ;;  %vm121_vm0 = vcmask 261120   ;;  %s343_s24 = smov 127   ;;  %v140_v7 = vld [vmem:[%s445_s0] sm:$0xff]  ;;  %vm142_vm1 = vcmask 7168  }
   0x5   :  { %v119_v5 = vmul.f32 %v117_v3, %v117_v3  ;;  %174 = vrot.lane.b32.xlu1 %v156_v4, %s343_s24  ;;  %v158_v12 = vsel %vm142_vm1, %v156_v4, 0.0  ;;  %vm109_vm2 = vcmask 0   ;;  %v344_v14 = vmov 0.0   ;;  %s345_s27 = smov [#allocation4]   ;;  %s346_s29 = smov [#allocation6]  }
   0x6   :  { %111 = vst.msk [vmem:[#allocation4] sm:$0x1] %vm109_vm2, %v344_v14  ;;  %112 = vst.msk [vmem:[#allocation6] sm:$0x1] %vm109_vm2, %v344_v14  ;;  %s219_s28 = sshll.u32 %s345_s27, 4  ;;  %s229_s30 = sshll.u32 %s346_s29, 4  ;;  %s220_s28 = int_to_ptr.vmem [resolvable:$true] %s219_s28  ;;  %s399_s30 = int_to_ptr.vmem [resolvable:$true] %s229_s30 }
   0x7   :  { %v122_v6 = vsel %vm121_vm0, %v119_v5, 0.0  ;;  %110 = vst.msk [vmem:[#allocation2] sm:$0x1] %vm109_vm2, %v344_v14  ;;  %s273_s6 = scalar_lea.vmem %s220_s28, 16  ;;  %s277_s7 = scalar_lea.vmem %s220_s28, 32 }
   0x8   :  { %123 = vadd.xlane.f32.xlu0 %v122_v6  ;;  %p274_p0 = scmp.ne.s32.totalorder %s220_s28, %s273_s6  ;;  %p278_p1 = scmp.lt.s32.totalorder %s220_s28, %s220_s28 }
   0x9   :  { %p279_p2 = scmp.lt.s32.totalorder %s277_s7, %s273_s6 }
   0xb   :  { %p280_p3 = por %p279_p2, %p278_p1 }
   0xd   :  { %v194_v34 = vld [vmem:[#allocation6] sm:$0x1]  ;;  %v198_v36 = vld [vmem:[#allocation4] sm:$0x1]  ;;  %p281_p4 = pnand %p280_p3, %p274_p0 }
  0x77   :  { %v175_v15 = vpop.permute.xlu1 %174 }
  0x78   :  { %v179_v16 = vsel %vm142_vm1, %v175_v15, 0.0 }
  0x95   :  { %v124_v8 = vpop.xlane.xlu0 %123 }
  0x96   :  { %v155_v9 = vmul.f32 %v140_v7, %v124_v8  ;;  %v143_v10 = vsel %vm142_vm1, %v124_v8, 0.0 }
  0x97   :  { %146 = vadd.xlane.f32.xlu1 %v143_v10 }
  0x98   :  { %172 = vrot.lane.b32.xlu0 %v155_v9, %s343_s24  ;;  %v157_v11 = vsel %vm142_vm1, %v155_v9, 0.0 }
  0x99   :  { %v159_v13 = vadd.f32 %v158_v12, %v157_v11 }
  0xb7   :  { %160 = vadd.xlane.f32.xlu0 %v159_v13 }
 0x10a   :  { %v173_v17 = vpop.permute.xlu0 %172 }
 0x10b   :  { %v178_v18 = vsel %vm142_vm1, %v173_v17, 0.0 }
 0x10c   :  { %v180_v19 = vadd.f32 %v179_v16, %v178_v18 }
 0x10e   :  { %181 = vadd.xlane.f32.xlu1 %v180_v19 }
 0x124   :  { %v147_v20 = vpop.xlane.xlu1 %146 }
 0x125   :  { %v148_v21 = vrot.slane %v147_v20, 4 }
 0x127   :  { %v149_v22 = vadd.f32 %v148_v21, %v147_v20 }
 0x129   :  { %v150_v23 = vrot.slane %v149_v22, 2 }
 0x12b   :  { %v151_v24 = vadd.f32 %v150_v23, %v149_v22 }
 0x12d   :  { %v152_v25 = vrot.slane %v151_v24, 1 }
 0x12f   :  { %v153_v26 = vadd.f32 %v152_v25, %v151_v24 }
 0x131   :  { %262 = vpush %v153_v26 }
 0x144   :  { %v161_v27 = vpop.xlane.xlu0 %160 }
 0x145   :  { %v162_v28 = vrot.slane %v161_v27, 4 }
 0x147   :  { %v163_v29 = vadd.f32 %v162_v28, %v161_v27 }
 0x149   :  { %v164_v30 = vrot.slane %v163_v29, 2 }
 0x14b   :  { %v165_v31 = vadd.f32 %v164_v30, %v163_v29 }
 0x14d   :  { %v166_v32 = vrot.slane %v165_v31, 1 }
 0x14f   :  { %v167_v33 = vadd.f32 %v166_v32, %v165_v31 }
 0x151   :  { %264 = vpush %v167_v33 }
 0x162   :  { %s263_s0 = spop %262 }
 0x182   :  { %s265_s1 = spop %264 }
 0x183   :  { %v195_v35 = vstv %s265_s1  ;;  %s199_s2 = ssub.f32 %s263_s0, %s265_s1 }
 0x184   :  { %v196_v37 = vadd.f32 %v195_v35, %v194_v34 }
 0x185   :  { %v200_v38 = vstv %s199_s2 }
 0x186   :  { %v201_v39 = vadd.f32 %v200_v38, %v198_v36  ;;  %197 = vst.msk [vmem:[#allocation6] sm:$0x1] %vm109_vm2, %v196_v37 }
 0x188   :  { %202 = vst.msk [vmem:[#allocation4] sm:$0x1] %vm109_vm2, %v201_v39 }
 0x189   :  { %284 = shalt.err (!%p281_p4)
}
 0x18a   :  { %s285_s10 = scalar_lea.hbm %s449_s4, 16 }
 0x18b   :  { %p286_p5 = scmp.ne.s32.totalorder %s449_s4, %s285_s10  ;;  %p289_p6 = scmp.lt.u32.totalorder %s285_s10, %s449_s4 }
 0x18d   :  { %p291_p7 = pnand %p289_p6, %p286_p5 }
 0x18f   :  { %294 = shalt.err (!%p291_p7)
}
 0x190   :  { %222 = dma.vmem_to_hbm [thread:$0]  %s220_s28, 16, %s449_s4, [#allocation5]  }
 0x191   :  { %s295_s17 = scalar_lea.vmem %s399_s30, 16  ;;  %s299_s18 = scalar_lea.vmem %s399_s30, 32 }
 0x192   :  { %p296_p8 = scmp.ne.s32.totalorder %s399_s30, %s295_s17  ;;  %p300_p9 = scmp.lt.s32.totalorder %s399_s30, %s399_s30 }
 0x193   :  { %p301_p10 = scmp.lt.s32.totalorder %s299_s18, %s295_s17 }
 0x195   :  { %p302_p11 = por %p301_p10, %p300_p9 }
 0x197   :  { %p303_p12 = pnand %p302_p11, %p296_p8 }
 0x199   :  { %306 = shalt.err (!%p303_p12)
}
 0x19a   :  { %s307_s21 = scalar_lea.hbm %s450_s5, 16 }
 0x19b   :  { %p308_p13 = scmp.ne.s32.totalorder %s450_s5, %s307_s21  ;;  %p311_p0 = scmp.lt.u32.totalorder %s307_s21, %s450_s5 }
 0x19d   :  { %p313_p1 = pnand %p311_p0, %p308_p13 }
 0x19f   :  { %316 = shalt.err (!%p313_p1)
}
 0x1a0   :  { %232 = dma.vmem_to_hbm [thread:$0]  %s399_s30, 16, %s450_s5, [#allocation5]   ;;  %v182_v40 = vpop.xlane.xlu1 %181  ;;  %v169_v47 = vld [vmem:[#allocation2] sm:$0x1] }
 0x1a1   :  { %v183_v41 = vrot.slane %v182_v40, 4  ;;  %s347_s0 = smov [#allocation2]  }
 0x1a2   :  { %s209_s1 = sshll.u32 %s347_s0, 4  ;;  %s210_s1 = int_to_ptr.vmem [resolvable:$true] %s209_s1 }
 0x1a3   :  { %v184_v42 = vadd.f32 %v183_v41, %v182_v40  ;;  %s317_s27 = scalar_lea.vmem %s210_s1, 16  ;;  %s321_s5 = scalar_lea.vmem %s210_s1, 32 }
 0x1a4   :  { %p318_p2 = scmp.ne.s32.totalorder %s210_s1, %s317_s27  ;;  %p322_p3 = scmp.lt.s32.totalorder %s210_s1, %s210_s1 }
 0x1a5   :  { %v185_v43 = vrot.slane %v184_v42, 2  ;;  %p323_p4 = scmp.lt.s32.totalorder %s321_s5, %s317_s27 }
 0x1a7   :  { %v186_v44 = vadd.f32 %v185_v43, %v184_v42  ;;  %p324_p5 = por %p323_p4, %p322_p3 }
 0x1a9   :  { %v187_v45 = vrot.slane %v186_v44, 1  ;;  %p325_p6 = pnand %p324_p5, %p318_p2 }
 0x1ab   :  { %v188_v46 = vadd.f32 %v187_v45, %v186_v44 }
 0x1ad   :  { %266 = vpush %v188_v46 }
 0x1de   :  { %s267_s2 = spop %266 }
 0x1df   :  { %v190_v48 = vstv %s267_s2 }
 0x1e0   :  { %v191_v49 = vadd.f32 %v190_v48, %v169_v47 }
 0x1e2   :  { %193 = vst.msk [vmem:[#allocation2] sm:$0x1] %vm109_vm2, %v191_v49 }
 0x1e3   :  { %328 = shalt.err (!%p325_p6)
}
 0x1e4   :  { %s329_s30 = scalar_lea.hbm %s448_s3, 16 }
 0x1e5   :  { %p330_p7 = scmp.ne.s32.totalorder %s448_s3, %s329_s30  ;;  %p333_p8 = scmp.lt.u32.totalorder %s329_s30, %s448_s3 }
 0x1e7   :  { %p335_p9 = pnand %p333_p8, %p330_p7 }
 0x1e9   :  { %338 = shalt.err (!%p335_p9)
}
 0x1ea   :  { %212 = dma.vmem_to_hbm [thread:$0]  %s210_s1, 16, %s448_s3, [#allocation3]  }
 0x1eb   :  { %339 = dma.done.wait [#allocation3], 16  }
 0x1ec   :  { %340 = vsyncadd [#allocation3], 4294967280 }
 0x1ed   :  { %341 = dma.done.wait [#allocation5], 32  }
 0x1ee   :  { %342 = vsyncadd [#allocation5], 4294967264 }
 0x1ef   :  { %242 = vsyncpa [#allocation3], 1 }
 0x1f0   :  { %243 = vsyncpa [#allocation5], 1 }

</bundles_post_ra>
